<compile_context>
chip_gen: v6e
topology: v6e:2x2x1
jax: 0.10.0
libtpu: 0.0.40
codegen_flags: <defaults>
</compile_context>

<pallas_src>
import jax
import jax.numpy as jnp
from jax.experimental import pallas as pl
from jax.experimental.pallas import tpu as pltpu


def critic_kernel(s_ref, a_ref,
                  w1s_ref, w1a_ref, b1_ref,
                  w2_ref, b2_ref,
                  w3_ref, b3_ref,
                  o_ref):
    # Layer 1: state-norm folded into (w1s, b1); concat replaced by two dots
    # into the same f32 accumulator.
    h = jnp.dot(s_ref[...], w1s_ref[...], preferred_element_type=jnp.float32)
    h = h + jnp.dot(a_ref[...], w1a_ref[...], preferred_element_type=jnp.float32)
    h = jnp.maximum(h + b1_ref[...], 0.0)

    # Layer 2
    h = jnp.dot(h, w2_ref[...], preferred_element_type=jnp.float32) + b2_ref[...]
    h = jnp.maximum(h, 0.0)

    # Layer 3: value re-norm folded into (w3, b3).
    o_ref[...] = jnp.dot(h, w3_ref[...], preferred_element_type=jnp.float32) + b3_ref[...]


def critic_forward(state, action, params, *, block_b=512):
    """Returns value of shape (batch,)."""
    batch, state_dim = state.shape
    action_dim = action.shape[1]
    h1 = params["w1"].shape[1]
    h2 = params["w2"].shape[1]

    # ---------- algebraic folding (tiny parameter-prep, plain JAX) ----------
    # Matches reference numerics: reference divides by std with no epsilon.
    inv_std = 1.0 / params["state_std"]
    w1 = params["w1"]
    w1s = w1[:state_dim] * inv_std[:, None]                       # (state_dim, h1)
    w1a = w1[state_dim:]                                          # (action_dim, h1)
    b1 = params["b1"] - (params["state_avg"] * inv_std) @ w1[:state_dim]   # (1, h1)

    vstd = params["value_std"].reshape(1, 1)
    vavg = params["value_avg"].reshape(1, 1)
    w3 = params["w3"] * vstd                                      # (h2, 1)
    b3 = params["b3"] * vstd + vavg                               # (1, 1)

    w2, b2 = params["w2"], params["b2"]

    # ---------- batch tiling: tile is a multiple of 8, weights stay resident ----------
    tb = min(block_b, max(8, -(-batch // 8) * 8))
    padded = -(-batch // tb) * tb
    if padded != batch:
        pad = padded - batch
        state = jnp.pad(state, ((0, pad), (0, 0)))
        action = jnp.pad(action, ((0, pad), (0, 0)))
    grid = (padded // tb,)

    def row_spec(d):
        return pl.BlockSpec((tb, d), lambda i: (i, 0))

    def const_spec(shape):
        return pl.BlockSpec(shape, lambda i: (0, 0))

    flops = 2 * padded * ((state_dim + action_dim) * h1 + h1 * h2 + h2)
    bytes_accessed = 4 * (
        padded * (state_dim + action_dim + 1)
        + (state_dim + action_dim) * h1 + h1
        + h1 * h2 + h2
        + h2 + 1
    )

    out = pl.pallas_call(
        critic_kernel,
        out_shape=jax.ShapeDtypeStruct((padded, 1), jnp.float32),
        grid=grid,
        in_specs=[
            row_spec(state_dim),
            row_spec(action_dim),
            const_spec(w1s.shape),
            const_spec(w1a.shape),
            const_spec(b1.shape),
            const_spec(w2.shape),
            const_spec(b2.shape),
            const_spec(w3.shape),
            const_spec(b3.shape),
        ],
        out_specs=pl.BlockSpec((tb, 1), lambda i: (i, 0)),
        compiler_params=pltpu.CompilerParams(
            dimension_semantics=("parallel",),
            vmem_limit_bytes=32 * 1024 * 1024,
        ),
        cost_estimate=pl.CostEstimate(
            flops=flops, transcendentals=0, bytes_accessed=bytes_accessed),
    )(state, action, w1s, w1a, b1, w2, b2, w3, b3)

    return out[:batch, 0]                                         # squeeze(dim=1)


def _orthogonal(key, shape, gain):
    # Deterministic orthogonal init (torch.nn.init.orthogonal_ analogue).
    a = jax.random.normal(key, shape, jnp.float32)
    q, r = jnp.linalg.qr(a if shape[0] >= shape[1] else a.T)
    q = q * jnp.sign(jnp.diag(r))[None, :]
    if shape[0] < shape[1]:
        q = q.T
    return gain * q[: shape[0], : shape[1]]


def init_params(key, state_dim, action_dim, dims):
    d_in = state_dim + action_dim
    k1, k2, k3 = jax.random.split(key, 3)
    h1, h2 = dims
    w1 = jax.random.normal(k1, (d_in, h1), jnp.float32) / jnp.sqrt(d_in)
    w2 = jax.random.normal(k2, (h1, h2), jnp.float32) / jnp.sqrt(h1)
    # output layer: orthogonal with std=0.5, bias=1e-6 (layer_init_with_orthogonal)
    w3 = _orthogonal(k3, (h2, 1), gain=0.5)
    return {
        "w1": w1, "b1": jnp.zeros((1, h1), jnp.float32),
        "w2": w2, "b2": jnp.zeros((1, h2), jnp.float32),
        "w3": w3, "b3": jnp.full((1, 1), 1e-6, jnp.float32),
        "state_avg": jnp.zeros((state_dim,), jnp.float32),
        "state_std": jnp.ones((state_dim,), jnp.float32),
        "value_avg": jnp.zeros((1,), jnp.float32),
        "value_std": jnp.ones((1,), jnp.float32),
    }


def reference_forward(state, action, p):
    # Mirrors the PyTorch module exactly (no folding), used as a numerics check.
    s = (state - p["state_avg"]) / p["state_std"]
    x = jnp.concatenate([s, action], axis=1)
    h = jnp.maximum(x @ p["w1"] + p["b1"], 0.0)
    h = jnp.maximum(h @ p["w2"] + p["b2"], 0.0)
    v = h @ p["w3"] + p["b3"]
    v = v * p["value_std"] + p["value_avg"]
    return v[:, 0]


if __name__ == "__main__":
    state_dim, action_dim = 16, 8
    dims = (32, 32)
    batch = 4

    key = jax.random.PRNGKey(0)
    kp, ks, ka = jax.random.split(key, 3)

    params = init_params(kp, state_dim, action_dim, dims)
    # Non-trivial running stats so the algebraic folds are actually exercised.
    params["state_avg"] = 0.1 * jnp.arange(state_dim, dtype=jnp.float32)
    params["state_std"] = 1.0 + 0.05 * jnp.arange(state_dim, dtype=jnp.float32)
    params["value_avg"] = jnp.array([0.3], jnp.float32)
    params["value_std"] = jnp.array([1.7], jnp.float32)

    state = jax.random.normal(ks, (batch, state_dim), jnp.float32)
    action = jax.random.normal(ka, (batch, action_dim), jnp.float32)

    out = critic_forward(state, action, params)
    out = jax.block_until_ready(out)

    ref = reference_forward(state, action, params)
    assert out.shape == (batch,)
    assert jnp.allclose(out, ref, atol=1e-5, rtol=1e-5), (out, ref)

    print("KERNEL_OK")
</pallas_src>

<mosaic_0001>
module attributes {stable_mosaic.version = 11 : i64} {
  func.func @critic_kernel(%arg0: i32, %arg1: memref<8x16xf32, #tpu.memory_space<vmem>>, %arg2: memref<8x8xf32, #tpu.memory_space<vmem>>, %arg3: memref<16x32xf32, #tpu.memory_space<vmem>>, %arg4: memref<8x32xf32, #tpu.memory_space<vmem>>, %arg5: memref<1x32xf32, #tpu.memory_space<vmem>>, %arg6: memref<32x32xf32, #tpu.memory_space<vmem>>, %arg7: memref<1x32xf32, #tpu.memory_space<vmem>>, %arg8: memref<32x1xf32, #tpu.memory_space<vmem>>, %arg9: memref<1x1xf32, #tpu.memory_space<vmem>>, %arg10: memref<8x1xf32, #tpu.memory_space<vmem>>) attributes {dimension_semantics = [#tpu.dimension_semantics<parallel>], iteration_bounds = array<i64: 1>, scalar_prefetch = 0 : i64, scratch_operands = 0 : i64, tpu.core_type = #tpu.core_type<tc>, window_params = [{transform_indices = @transform_0, window_bounds = array<i64: 8, 16>}, {transform_indices = @transform_1, window_bounds = array<i64: 8, 8>}, {pipeline_mode = #tpu.pipeline_mode<synchronous>, transform_indices = @transform_2, window_bounds = array<i64: 16, 32>}, {pipeline_mode = #tpu.pipeline_mode<synchronous>, transform_indices = @transform_3, window_bounds = array<i64: 8, 32>}, {pipeline_mode = #tpu.pipeline_mode<synchronous>, transform_indices = @transform_4, window_bounds = array<i64: 1, 32>}, {pipeline_mode = #tpu.pipeline_mode<synchronous>, transform_indices = @transform_5, window_bounds = array<i64: 32, 32>}, {pipeline_mode = #tpu.pipeline_mode<synchronous>, transform_indices = @transform_6, window_bounds = array<i64: 1, 32>}, {pipeline_mode = #tpu.pipeline_mode<synchronous>, transform_indices = @transform_7, window_bounds = array<i64: 32, 1>}, {pipeline_mode = #tpu.pipeline_mode<synchronous>, transform_indices = @transform_8, window_bounds = array<i64: 1, 1>}, {transform_indices = @transform_9, window_bounds = array<i64: 8, 1>}]} {
    %c0 = arith.constant 0 : index
    %c0_0 = arith.constant 0 : index
    %0 = vector.load %arg1[%c0, %c0_0] : memref<8x16xf32, #tpu.memory_space<vmem>>, vector<8x16xf32>
    %c0_1 = arith.constant 0 : index
    %c0_2 = arith.constant 0 : index
    %1 = vector.load %arg3[%c0_1, %c0_2] : memref<16x32xf32, #tpu.memory_space<vmem>>, vector<16x32xf32>
    %cst = arith.constant dense<0.000000e+00> : vector<8x32xf32>
    %2 = tpu.matmul %0, %1, %cst {dimension_numbers = #tpu.dot_dimension_numbers<[1], [0], [0], [1], [0, 0, 1, 1], [], []>} : vector<8x16xf32>, vector<16x32xf32>, vector<8x32xf32> -> vector<8x32xf32>
    %c0_3 = arith.constant 0 : index
    %c0_4 = arith.constant 0 : index
    %3 = vector.load %arg2[%c0_3, %c0_4] : memref<8x8xf32, #tpu.memory_space<vmem>>, vector<8x8xf32>
    %c0_5 = arith.constant 0 : index
    %c0_6 = arith.constant 0 : index
    %4 = vector.load %arg4[%c0_5, %c0_6] : memref<8x32xf32, #tpu.memory_space<vmem>>, vector<8x32xf32>
    %cst_7 = arith.constant dense<0.000000e+00> : vector<8x32xf32>
    %5 = tpu.matmul %3, %4, %cst_7 {dimension_numbers = #tpu.dot_dimension_numbers<[1], [0], [0], [1], [0, 0, 1, 1], [], []>} : vector<8x8xf32>, vector<8x32xf32>, vector<8x32xf32> -> vector<8x32xf32>
    %6 = arith.addf %2, %5 : vector<8x32xf32>
    %c0_8 = arith.constant 0 : index
    %c0_9 = arith.constant 0 : index
    %7 = vector.load %arg5[%c0_8, %c0_9] : memref<1x32xf32, #tpu.memory_space<vmem>>, vector<1x32xf32>
    %8 = vector.broadcast %7 : vector<1x32xf32> to vector<8x32xf32>
    %9 = arith.addf %6, %8 : vector<8x32xf32>
    %cst_10 = arith.constant 0.000000e+00 : f32
    %10 = vector.broadcast %cst_10 : f32 to vector<8x32xf32>
    %11 = arith.maximumf %9, %10 : vector<8x32xf32>
    %c0_11 = arith.constant 0 : index
    %c0_12 = arith.constant 0 : index
    %12 = vector.load %arg6[%c0_11, %c0_12] : memref<32x32xf32, #tpu.memory_space<vmem>>, vector<32x32xf32>
    %cst_13 = arith.constant dense<0.000000e+00> : vector<8x32xf32>
    %13 = tpu.matmul %11, %12, %cst_13 {dimension_numbers = #tpu.dot_dimension_numbers<[1], [0], [0], [1], [0, 0, 1, 1], [], []>} : vector<8x32xf32>, vector<32x32xf32>, vector<8x32xf32> -> vector<8x32xf32>
    %c0_14 = arith.constant 0 : index
    %c0_15 = arith.constant 0 : index
    %14 = vector.load %arg7[%c0_14, %c0_15] : memref<1x32xf32, #tpu.memory_space<vmem>>, vector<1x32xf32>
    %15 = vector.broadcast %14 : vector<1x32xf32> to vector<8x32xf32>
    %16 = arith.addf %13, %15 : vector<8x32xf32>
    %cst_16 = arith.constant 0.000000e+00 : f32
    %17 = vector.broadcast %cst_16 : f32 to vector<8x32xf32>
    %18 = arith.maximumf %16, %17 : vector<8x32xf32>
    %c0_17 = arith.constant 0 : index
    %c0_18 = arith.constant 0 : index
    %19 = vector.load %arg8[%c0_17, %c0_18] : memref<32x1xf32, #tpu.memory_space<vmem>>, vector<32x1xf32>
    %cst_19 = arith.constant dense<0.000000e+00> : vector<8x1xf32>
    %20 = tpu.matmul %18, %19, %cst_19 {dimension_numbers = #tpu.dot_dimension_numbers<[1], [0], [0], [1], [0, 0, 1, 1], [], []>} : vector<8x32xf32>, vector<32x1xf32>, vector<8x1xf32> -> vector<8x1xf32>
    %c0_20 = arith.constant 0 : index
    %c0_21 = arith.constant 0 : index
    %21 = vector.load %arg9[%c0_20, %c0_21] : memref<1x1xf32, #tpu.memory_space<vmem>>, vector<1x1xf32>
    %22 = vector.broadcast %21 : vector<1x1xf32> to vector<8x1xf32>
    %23 = arith.addf %20, %22 : vector<8x1xf32>
    %c0_22 = arith.constant 0 : index
    %c0_23 = arith.constant 0 : index
    %24 = vector.load %arg10[%c0_22, %c0_23] : memref<8x1xf32, #tpu.memory_space<vmem>>, vector<8x1xf32>
    tpu.vector_store %arg10[%c0_22, %c0_23], %23 {strides = array<i32>} : memref<8x1xf32, #tpu.memory_space<vmem>>, vector<8x1xf32>,
    return
  }
  func.func @transform_0(%arg0: i32) -> (i32, i32) {
    %c0_i32 = arith.constant 0 : i32
    %c0_i32_0 = arith.constant 0 : i32
    return %arg0, %c0_i32 : i32, i32
  }
  func.func @transform_1(%arg0: i32) -> (i32, i32) {
    %c0_i32 = arith.constant 0 : i32
    %c0_i32_0 = arith.constant 0 : i32
    return %arg0, %c0_i32 : i32, i32
  }
  func.func @transform_2(%arg0: i32) -> (i32, i32) {
    %c0_i32 = arith.constant 0 : i32
    %c0_i32_0 = arith.constant 0 : i32
    %c0_i32_1 = arith.constant 0 : i32
    return %c0_i32, %c0_i32_0 : i32, i32
  }
  func.func @transform_3(%arg0: i32) -> (i32, i32) {
    %c0_i32 = arith.constant 0 : i32
    %c0_i32_0 = arith.constant 0 : i32
    %c0_i32_1 = arith.constant 0 : i32
    return %c0_i32, %c0_i32_0 : i32, i32
  }
  func.func @transform_4(%arg0: i32) -> (i32, i32) {
    %c0_i32 = arith.constant 0 : i32
    %c0_i32_0 = arith.constant 0 : i32
    %c0_i32_1 = arith.constant 0 : i32
    return %c0_i32, %c0_i32_0 : i32, i32
  }
  func.func @transform_5(%arg0: i32) -> (i32, i32) {
    %c0_i32 = arith.constant 0 : i32
    %c0_i32_0 = arith.constant 0 : i32
    %c0_i32_1 = arith.constant 0 : i32
    return %c0_i32, %c0_i32_0 : i32, i32
  }
  func.func @transform_6(%arg0: i32) -> (i32, i32) {
    %c0_i32 = arith.constant 0 : i32
    %c0_i32_0 = arith.constant 0 : i32
    %c0_i32_1 = arith.constant 0 : i32
    return %c0_i32, %c0_i32_0 : i32, i32
  }
  func.func @transform_7(%arg0: i32) -> (i32, i32) {
    %c0_i32 = arith.constant 0 : i32
    %c0_i32_0 = arith.constant 0 : i32
    %c0_i32_1 = arith.constant 0 : i32
    return %c0_i32, %c0_i32_0 : i32, i32
  }
  func.func @transform_8(%arg0: i32) -> (i32, i32) {
    %c0_i32 = arith.constant 0 : i32
    %c0_i32_0 = arith.constant 0 : i32
    %c0_i32_1 = arith.constant 0 : i32
    return %c0_i32, %c0_i32_0 : i32, i32
  }
  func.func @transform_9(%arg0: i32) -> (i32, i32) {
    %c0_i32 = arith.constant 0 : i32
    %c0_i32_0 = arith.constant 0 : i32
    return %arg0, %c0_i32 : i32, i32
  }
}

</mosaic_0001>

<bundles_post_ra>
// kernel: tpu_custom_call.1
= control target key start
LH: loop header
LB: loop body
LE: loop exit
PB: predicated region body
PF: predicated region fallthrough
CT: control target
= control target key end

     0   :  { %s649_s0 = inlined_call_operand.vmem [shape: f32[8,16], index: 0, kind: input, shape index: {}]   ;;  %s650_s1 = inlined_call_operand.hbm [shape: f32[8,8], index: 1, kind: input, shape index: {}]   ;;  %s651_s2 = inlined_call_operand.hbm [shape: f32[16,32], index: 2, kind: input, shape index: {}]   ;;  %s652_s3 = inlined_call_operand.hbm [shape: f32[8,32], index: 3, kind: input, shape index: {}]   ;;  %s653_s4 = inlined_call_operand.vmem [shape: f32[1,32], index: 4, kind: input, shape index: {}]   ;;  %s654_s5 = inlined_call_operand.vmem [shape: f32[32,32], index: 5, kind: input, shape index: {}]   ;;  %s655_s6 = inlined_call_operand.vmem [shape: f32[1,32], index: 6, kind: input, shape index: {}]   ;;  %s656_s7 = inlined_call_operand.vmem [shape: f32[32,1], index: 7, kind: input, shape index: {}]   ;;  %s657_s8 = inlined_call_operand.<no memory space> [shape: f32[1,1], index: 8, kind: input, shape index: {}]   ;;  %s658_s9 = inlined_call_operand.vmem [shape: f32[8,1], index: 9, kind: output, shape index: {}]  }
   0x1   :  { %v14_v0 = vstv %s657_s8 }
   0x2   :  { %15 = vst [vmem:[#allocation2] sm:$0x1] %v14_v0 }
   0x3   :  { %16 = vsyncpa [#allocation4], 0 }
   0x4   :  { %17 = vsyncpa [#allocation6], 0  ;;  %s538_s11 = smov [#allocation5]  }
   0x5   :  { %s35_s12 = sshll.u32 %s538_s11, 4  ;;  %s36_s12 = int_to_ptr.vmem [resolvable:$true] %s35_s12 }
   0x6   :  { %s482_s13 = scalar_lea.vmem %s36_s12, 256  ;;  %p487_p1 = scmp.lt.s32.totalorder %s36_s12, %s36_s12 }
   0x7   :  { %p483_p0 = scmp.ne.s32.totalorder %s36_s12, %s482_s13  ;;  %p488_p2 = scmp.lt.s32.totalorder %s482_s13, %s482_s13 }
   0x9   :  { %p489_p3 = por %p488_p2, %p487_p1 }
   0xb   :  { %p490_p4 = pnand %p489_p3, %p483_p0 }
   0xd   :  { %493 = shalt.err (!%p490_p4)
}
   0xe   :  { %s539_s14 = smov 128   ;;  %s540_s15 = smov 8  }
   0xf   :  { %41 = dma.hbm_to_vmem [thread:$0]  %s651_s2, 256, %s36_s12, [#allocation6], %s539_s14, %s539_s14, %s540_s15  }
  0x10   :  { %s541_s8 = smov [#allocation3]   ;;  %s542_s19 = smov [#allocation7]  }
  0x11   :  { %s26_s18 = sshll.u32 %s541_s8, 4  ;;  %s48_s20 = sshll.u32 %s542_s19, 4  ;;  %s27_s18 = int_to_ptr.vmem [resolvable:$true] %s26_s18  ;;  %s49_s20 = int_to_ptr.vmem [resolvable:$true] %s48_s20 }
  0x12   :  { %s502_s21 = scalar_lea.vmem %s27_s18, 128  ;;  %p507_p6 = scmp.lt.s32.totalorder %s27_s18, %s27_s18 }
  0x13   :  { %p503_p5 = scmp.ne.s32.totalorder %s27_s18, %s502_s21  ;;  %p508_p7 = scmp.lt.s32.totalorder %s502_s21, %s502_s21 }
  0x15   :  { %p509_p8 = por %p508_p7, %p507_p6 }
  0x17   :  { %p510_p9 = pnand %p509_p8, %p503_p5 }
  0x19   :  { %513 = shalt.err (!%p510_p9)
}
  0x1a   :  { %29 = dma.hbm_to_vmem [thread:$0]  %s650_s1, 128, %s27_s18, [#allocation4]  }
  0x1b   :  { %s522_s24 = scalar_lea.vmem %s49_s20, 128  ;;  %p527_p11 = scmp.lt.s32.totalorder %s49_s20, %s49_s20 }
  0x1c   :  { %p523_p10 = scmp.ne.s32.totalorder %s49_s20, %s522_s24  ;;  %p528_p12 = scmp.lt.s32.totalorder %s522_s24, %s522_s24 }
  0x1e   :  { %p529_p13 = por %p528_p12, %p527_p11 }
  0x20   :  { %p530_p0 = pnand %p529_p13, %p523_p10 }
  0x22   :  { %533 = shalt.err (!%p530_p0)
}
  0x23   :  { %51 = dma.hbm_to_vmem [thread:$0]  %s652_s3, 128, %s49_s20, [#allocation6]  }
  0x24   :  { %534 = dma.done.wait [#allocation4], 128  }
  0x25   :  { %535 = vsyncadd [#allocation4], 4294967168 }
  0x26   :  { %536 = dma.done.wait [#allocation6], 384  }
  0x27   :  { %537 = vsyncadd [#allocation6], 4294966912  ;;  %v543_v1 = vmov 0.0   ;;  %vm544_vm0 = vmmov 0   ;;  %vm76_vm1 = vcmask 64512   ;;  %v75_v2 = vld [vmem:[#allocation7] sm:$0xff] }
  0x28   :  { %433 = vmatprep.subr.mxu0 %v543_v1  ;;  %438 = vmatprep.subr.mxu1 %v543_v1  ;;  %v73_v3 = vld [vmem:[#allocation5 + $0x8] sm:$0xff]  ;;  %v74_v4 = vld [vmem:[#allocation3] sm:$0xff]  ;;  %v72_v5 = vld [vmem:[#allocation5] sm:$0xff]  ;;  %vm150_vm2 = vcmask 130048   ;;  %vm244_vm3 = vcmask 261120   ;;  %vm403_vm4 = vcmask 7168  }
  0x29   :  { %435 = vmatprep.mubr.msk.f32.mxu0 %vm544_vm0, %v543_v1  ;;  %442 = vmatprep.mubr.msk.f32.mxu1 %vm544_vm0, %v543_v1  ;;  %v71_v6 = vld [vmem:[%s649_s0] sm:$0xff]  ;;  %v236_v7 = vld [vmem:[%s654_s5 + $0x18] sm:$0xff]  ;;  %v235_v8 = vld [vmem:[%s654_s5 + $0x10] sm:$0xff] }
  0x2a   :  { %434 = vmatpush3.msra.mxu0 %v75_v2  ;;  %439 = vmatpush3.msra.mxu1 %v73_v3  ;;  %v234_v9 = vld [vmem:[%s654_s5 + $0x8] sm:$0xff]  ;;  %v233_v10 = vld [vmem:[%s654_s5] sm:$0xff]  ;;  %v322_v11 = vld [vmem:[%s656_s7 + $0x18] sm:$0xff] }
  0x2b   :  { %436 = vmatmul.mubr.msk.f32.vlgmr.msra.gmra.mxu0 %vm76_vm1, %v74_v4  ;;  %440 = vmatprep.subr.mxu1 %v543_v1  ;;  %v413_v15 = vld [vmem:[%s653_s4] ss:$0 sm:$0xff]  ;;  %v321_v20 = vld [vmem:[%s656_s7 + $0x10] sm:$0xff]  ;;  %v320_v21 = vld [vmem:[%s656_s7 + $0x8] sm:$0xff] }
  0x2c   :  { %441 = vmatpush3.msra.mxu1 %v72_v5  ;;  %445 = vmatprep.subr.mxu0 %v543_v1  ;;  %v319_v22 = vld [vmem:[%s656_s7] sm:$0xff] }
  0x2d   :  { %443 = vmatmul.mubr.msk.f32.vlgmr.msra.gmra.mxu1 %vm150_vm2, %v71_v6  ;;  %453 = vmatprep.mubr.msk.f32.mxu0 %vm544_vm0, %v543_v1  ;;  %v414_v23 = vld [vmem:[%s655_s6] ss:$0 sm:$0xff] }
  0x2e   :  { %456 = vmatprep.subr.mxu1 %v543_v1  ;;  %464 = vmatprep.mubr.msk.f32.mxu1 %vm544_vm0, %v543_v1  ;;  %v416_v28 = vld [vmem:[#allocation2] ss:$0 sm:$0xff] }
  0x2f   :  { %446 = vmatpush3.msra.mxu0 %v236_v7  ;;  %457 = vmatpush3.msra.mxu1 %v322_v11 }
  0x30   :  { %447 = vmatprep.subr.mxu0 %v543_v1  ;;  %458 = vmatprep.subr.mxu1 %v543_v1 }
  0x31   :  { %448 = vmatpush3.msra.mxu0 %v235_v8  ;;  %459 = vmatpush3.msra.mxu1 %v321_v20 }
  0x32   :  { %449 = vmatprep.subr.mxu0 %v543_v1  ;;  %460 = vmatprep.subr.mxu1 %v543_v1 }
  0x33   :  { %450 = vmatpush3.msra.mxu0 %v234_v9  ;;  %461 = vmatpush3.msra.mxu1 %v320_v21 }
  0x34   :  { %451 = vmatprep.subr.mxu0 %v543_v1  ;;  %462 = vmatprep.subr.mxu1 %v543_v1 }
  0x35   :  { %452 = vmatpush3.msra.mxu0 %v233_v10  ;;  %463 = vmatpush3.msra.mxu1 %v319_v22 }
  0xeb   :  { %v146_v12 = vpop.f32.mrf.mxu0 }
  0xed   :  { %v437_v13 = vpop.f32.mrf.mxu0  ;;  %v220_v14 = vpop.f32.mrf.mxu1 }
  0xee   :  { %v221_v16 = vadd.f32 %v220_v14, %v146_v12 }
  0xef   :  { %v444_v17 = vpop.f32.mrf.mxu1 }
  0xf0   :  { %v231_v18 = vadd.f32 %v413_v15, %v221_v16 }
  0xf2   :  { %v232_v19 = vmax.f32 %v231_v18, 0.0 }
  0xf4   :  { %454 = vmatmul.mubr.msk.f32.vlgmr.msra.gmra.mxu0 %vm244_vm3, %v232_v19 }
 0x1b4   :  { %v314_v24 = vpop.f32.mrf.mxu0 }
 0x1b5   :  { %v315_v25 = vadd.f32 %v414_v23, %v314_v24 }
 0x1b6   :  { %v455_v26 = vpop.f32.mrf.mxu0 }
 0x1b7   :  { %v318_v27 = vmax.f32 %v315_v25, 0.0 }
 0x1b9   :  { %465 = vmatmul.mubr.msk.f32.vlgmr.msra.gmra.mxu1 %vm244_vm3, %v318_v27 }
 0x279   :  { %v399_v29 = vpop.f32.mrf.mxu1 }
 0x27a   :  { %v400_v30 = vadd.f32 %v416_v28, %v399_v29 }
 0x27b   :  { %v466_v31 = vpop.f32.mrf.mxu1 }
 0x27c   :  { %404 = vst.msk [vmem:[%s658_s9] sm:$0xff] %vm403_vm4, %v400_v30 }
 0x27d   :  { %409 = vsyncpa [#allocation4], 1 }
 0x27e   :  { %410 = vsyncpa [#allocation6], 1 }

</bundles_post_ra>
